<compile_context>
chip_gen: v7x
topology: tpu7x:2x2x1
jax: 0.10.0
libtpu: 0.0.40
codegen_flags: <defaults>
</compile_context>

<pallas_src>
import jax
import jax.numpy as jnp
from jax.experimental import pallas as pl
from jax.experimental.pallas import tpu as pltpu


def context_attention_kernel(ref_ref, ctx_ref,
                             w_ref_big_ref, w_comb_ref, bias_ref,
                             w_alpha_big_ref, expand_ref, sumsel_ref,
                             out_ref, alphas_ref):
    ref_flat = ref_ref[...]                         # (B, T*H)
    ctx_flat = ctx_ref[...]                         # (B, Tc*G)

    # Pre-tanh activations in flat-lane layout (B, T*A): two lane-dense MXU matmuls.
    ref_att = jnp.dot(ref_flat, w_ref_big_ref[...],
                      preferred_element_type=jnp.float32)          # (B, T*A)
    ctx_hid = jnp.dot(ctx_flat, w_comb_ref[...],
                      preferred_element_type=jnp.float32)          # (B, T*A)
    e = jnp.tanh(ref_att + ctx_hid + bias_ref[...])                # (B, T*A), EUP

    # Alpha projection (1/temperature already folded into the weight).
    logits = jnp.dot(e, w_alpha_big_ref[...],
                     preferred_element_type=jnp.float32)           # (B, T)

    # Softmax over the sequence axis T (lane reduce), single reciprocal.
    m = jnp.max(logits, axis=1, keepdims=True)
    p = jnp.exp(logits - m)
    denom = jnp.sum(p, axis=1, keepdims=True)
    alphas = p * pl.reciprocal(denom, approx=False)                # (B, T)
    alphas_ref[...] = alphas

    # output[b, h] = sum_t reference[b, t, h] * alphas[b, t]:
    #   expand alphas over the H lanes of each t-group (0/1 matmul), VPU multiply,
    #   then a 0/1 selection matmul sums the T groups back down to H lanes.
    alphas_big = jnp.dot(alphas, expand_ref[...],
                         preferred_element_type=jnp.float32)       # (B, T*H)
    weighted = ref_flat * alphas_big                               # (B, T*H), VPU
    out_ref[...] = jnp.dot(weighted, sumsel_ref[...],
                           preferred_element_type=jnp.float32)     # (B, H)


def _round_up(x, m):
    return ((x + m - 1) // m) * m


def context_attention(reference, context, params, *, temperature=1.0, b_tile=512):
    bs, T, H = reference.shape
    _, Tc, G = context.shape
    A = params["w_ref"].shape[1]

    # ---- batch tile selection ---------------------------------------------
    b_tile = max(8, min(int(b_tile), _round_up(bs, 8)))
    b_tile = (b_tile // 8) * 8
    # v7x has two TensorCores: keep >= 2 grid steps when there is enough work so
    # dimension_semantics=("parallel",) can shard batch tiles across both cores.
    if bs >= 256 and -(-bs // b_tile) < 2:
        b_tile = _round_up(-(-bs // 2), 8)
    bs_pad = _round_up(bs, b_tile)

    # ---- flatten inputs (free, contiguous reshapes) and pad the batch ------
    ref_flat = jnp.reshape(reference.astype(jnp.float32), (bs, T * H))
    ctx_flat = jnp.reshape(context.astype(jnp.float32), (bs, Tc * G))
    if bs_pad != bs:
        pad = bs_pad - bs
        ref_flat = jnp.pad(ref_flat, ((0, pad), (0, 0)))
        ctx_flat = jnp.pad(ctx_flat, ((0, pad), (0, 0)))

    # ---- fold all small projections into lane-dense weight slabs -----------
    w_ref = params["w_ref"].astype(jnp.float32)                    # (H, A)
    w_ctx = params["w_ctx"].astype(jnp.float32)                    # (G, A)
    w_chp = params["w_chp"].astype(jnp.float32)                    # (T, Tc)
    b_ref = params["b_ref"].reshape(A).astype(jnp.float32)
    b_ctx = params["b_ctx"].reshape(A).astype(jnp.float32)
    b_chp = params["b_chp"].reshape(T).astype(jnp.float32)
    w_alpha = params["w_alpha"].reshape(A, 1).astype(jnp.float32)

    eye_t = jnp.eye(T, dtype=jnp.float32)
    w_ref_big = jnp.kron(eye_t, w_ref)                              # (T*H, T*A)
    w_comb = jnp.kron(w_chp.T, w_ctx)                               # (Tc*G, T*A)
    w_alpha_big = jnp.kron(eye_t, w_alpha) * (1.0 / temperature)    # (T*A, T)
    bias_flat = (b_ref[None, :] + b_chp[:, None]
                 + jnp.sum(w_chp, axis=1)[:, None] * b_ctx[None, :]
                 ).reshape(1, T * A)                                # (1, T*A)
    expand = jnp.kron(eye_t, jnp.ones((1, H), jnp.float32))         # (T, T*H)
    sumsel = jnp.tile(jnp.eye(H, dtype=jnp.float32), (T, 1))        # (T*H, H)

    grid = (bs_pad // b_tile,)

    out, alphas = pl.pallas_call(
        context_attention_kernel,
        out_shape=(
            jax.ShapeDtypeStruct((bs_pad, H), jnp.float32),
            jax.ShapeDtypeStruct((bs_pad, T), jnp.float32),
        ),
        grid_spec=pltpu.PrefetchScalarGridSpec(
            num_scalar_prefetch=0,
            grid=grid,
            in_specs=[
                pl.BlockSpec((b_tile, T * H), lambda b: (b, 0)),    # reference (flat)
                pl.BlockSpec((b_tile, Tc * G), lambda b: (b, 0)),   # context (flat)
                pl.BlockSpec((T * H, T * A), lambda b: (0, 0)),     # W_ref_big
                pl.BlockSpec((Tc * G, T * A), lambda b: (0, 0)),    # W_comb
                pl.BlockSpec((1, T * A), lambda b: (0, 0)),         # bias_flat
                pl.BlockSpec((T * A, T), lambda b: (0, 0)),         # W_alpha_big
                pl.BlockSpec((T, T * H), lambda b: (0, 0)),         # expand
                pl.BlockSpec((T * H, H), lambda b: (0, 0)),         # sumsel
            ],
            out_specs=[
                pl.BlockSpec((b_tile, H), lambda b: (b, 0)),
                pl.BlockSpec((b_tile, T), lambda b: (b, 0)),
            ],
        ),
        compiler_params=pltpu.CompilerParams(
            dimension_semantics=("parallel",)),
    )(ref_flat, ctx_flat, w_ref_big, w_comb, bias_flat,
      w_alpha_big, expand, sumsel)

    return out[:bs], alphas[:bs]


def init_params(key, *, H, T, G, Tc, A):
    """Deterministic N(0, 0.1) init (as in the original TF version)."""
    ks = jax.random.split(key, 7)
    n = lambda k, s: (0.1 * jax.random.normal(k, s)).astype(jnp.float32)
    return {
        "w_ref":   n(ks[0], (H, A)),    # reference_projection weight (transposed)
        "b_ref":   n(ks[1], (1, A)),
        "w_ctx":   n(ks[2], (G, A)),    # context_projection weight (transposed)
        "b_ctx":   n(ks[3], (1, A)),
        "w_chp":   n(ks[4], (T, Tc)),   # context_hidden_projection (Tc -> T)
        "b_chp":   n(ks[5], (T, 1)),
        "w_alpha": n(ks[6], (A, 1)),    # alpha_projection (no bias)
    }


def context_attention_reference(reference, context, params, *, temperature=1.0):
    """Pure-JAX reference mirroring the PyTorch forward (average_seq=True)."""
    ref_att = reference @ params["w_ref"] + params["b_ref"]                     # (bs,T,A)
    ctx_att = context @ params["w_ctx"] + params["b_ctx"]                       # (bs,Tc,A)
    ctx_hid = jnp.einsum("tc,bca->bta", params["w_chp"], ctx_att) \
        + params["b_chp"][None, :, :]                                           # (bs,T,A)
    e = jnp.tanh(ref_att + ctx_hid)
    logits = (e @ params["w_alpha"])[..., 0] / temperature                      # (bs,T)
    alphas = jax.nn.softmax(logits, axis=1)
    out = jnp.sum(reference * alphas[..., None], axis=1)                        # (bs,H)
    return out, alphas


if __name__ == "__main__":
    # Small shapes consistent with the module:
    #   bs=2, ref_seq T=8, ref_hidden H=32, ctx_seq Tc=4, ctx_hidden G=16, attention A=16
    bs, T, H, Tc, G, A = 2, 8, 32, 4, 16, 16
    temperature = 1.0

    key = jax.random.PRNGKey(0)
    k_ref, k_ctx, k_par = jax.random.split(key, 3)
    reference = jax.random.normal(k_ref, (bs, T, H), dtype=jnp.float32)
    context = jax.random.normal(k_ctx, (bs, Tc, G), dtype=jnp.float32)
    params = init_params(k_par, H=H, T=T, G=G, Tc=Tc, A=A)

    out, alphas = context_attention(reference, context, params,
                                    temperature=temperature)
    out = jax.block_until_ready(out)
    alphas = jax.block_until_ready(alphas)

    out_ref, alphas_ref = context_attention_reference(
        reference, context, params, temperature=temperature)

    assert out.shape == (bs, H) and alphas.shape == (bs, T)
    assert jnp.allclose(out, out_ref, atol=1e-5, rtol=1e-5)
    assert jnp.allclose(alphas, alphas_ref, atol=1e-5, rtol=1e-5)

    print("KERNEL_OK")
</pallas_src>

<mosaic_0001>
module attributes {stable_mosaic.version = 11 : i64} {
  func.func @context_attention_kernel(%arg0: i32, %arg1: memref<8x256xf32, #tpu.memory_space<vmem>>, %arg2: memref<8x64xf32, #tpu.memory_space<vmem>>, %arg3: memref<256x128xf32, #tpu.memory_space<vmem>>, %arg4: memref<64x128xf32, #tpu.memory_space<vmem>>, %arg5: memref<1x128xf32, #tpu.memory_space<vmem>>, %arg6: memref<128x8xf32, #tpu.memory_space<vmem>>, %arg7: memref<8x256xf32, #tpu.memory_space<vmem>>, %arg8: memref<256x32xf32, #tpu.memory_space<vmem>>, %arg9: memref<8x32xf32, #tpu.memory_space<vmem>>, %arg10: memref<8x8xf32, #tpu.memory_space<vmem>>) attributes {dimension_semantics = [#tpu.dimension_semantics<parallel>], iteration_bounds = array<i64: 1>, scalar_prefetch = 0 : i64, scratch_operands = 0 : i64, tpu.core_type = #tpu.core_type<tc>, window_params = [{transform_indices = @transform_0, window_bounds = array<i64: 8, 256>}, {transform_indices = @transform_1, window_bounds = array<i64: 8, 64>}, {pipeline_mode = #tpu.pipeline_mode<synchronous>, transform_indices = @transform_2, window_bounds = array<i64: 256, 128>}, {pipeline_mode = #tpu.pipeline_mode<synchronous>, transform_indices = @transform_3, window_bounds = array<i64: 64, 128>}, {pipeline_mode = #tpu.pipeline_mode<synchronous>, transform_indices = @transform_4, window_bounds = array<i64: 1, 128>}, {pipeline_mode = #tpu.pipeline_mode<synchronous>, transform_indices = @transform_5, window_bounds = array<i64: 128, 8>}, {pipeline_mode = #tpu.pipeline_mode<synchronous>, transform_indices = @transform_6, window_bounds = array<i64: 8, 256>}, {pipeline_mode = #tpu.pipeline_mode<synchronous>, transform_indices = @transform_7, window_bounds = array<i64: 256, 32>}, {transform_indices = @transform_8, window_bounds = array<i64: 8, 32>}, {transform_indices = @transform_9, window_bounds = array<i64: 8, 8>}]} {
    %c0 = arith.constant 0 : index
    %c0_0 = arith.constant 0 : index
    %0 = vector.load %arg1[%c0, %c0_0] : memref<8x256xf32, #tpu.memory_space<vmem>>, vector<8x256xf32>
    %c0_1 = arith.constant 0 : index
    %c0_2 = arith.constant 0 : index
    %1 = vector.load %arg2[%c0_1, %c0_2] : memref<8x64xf32, #tpu.memory_space<vmem>>, vector<8x64xf32>
    %c0_3 = arith.constant 0 : index
    %c0_4 = arith.constant 0 : index
    %2 = vector.load %arg3[%c0_3, %c0_4] : memref<256x128xf32, #tpu.memory_space<vmem>>, vector<256x128xf32>
    %cst = arith.constant dense<0.000000e+00> : vector<8x128xf32>
    %3 = tpu.matmul %0, %2, %cst {dimension_numbers = #tpu.dot_dimension_numbers<[1], [0], [0], [1], [0, 0, 1, 1], [], []>} : vector<8x256xf32>, vector<256x128xf32>, vector<8x128xf32> -> vector<8x128xf32>
    %c0_5 = arith.constant 0 : index
    %c0_6 = arith.constant 0 : index
    %4 = vector.load %arg4[%c0_5, %c0_6] : memref<64x128xf32, #tpu.memory_space<vmem>>, vector<64x128xf32>
    %cst_7 = arith.constant dense<0.000000e+00> : vector<8x128xf32>
    %5 = tpu.matmul %1, %4, %cst_7 {dimension_numbers = #tpu.dot_dimension_numbers<[1], [0], [0], [1], [0, 0, 1, 1], [], []>} : vector<8x64xf32>, vector<64x128xf32>, vector<8x128xf32> -> vector<8x128xf32>
    %6 = arith.addf %3, %5 : vector<8x128xf32>
    %c0_8 = arith.constant 0 : index
    %c0_9 = arith.constant 0 : index
    %7 = vector.load %arg5[%c0_8, %c0_9] : memref<1x128xf32, #tpu.memory_space<vmem>>, vector<1x128xf32>
    %8 = vector.broadcast %7 : vector<1x128xf32> to vector<8x128xf32>
    %9 = arith.addf %6, %8 : vector<8x128xf32>
    %10 = math.tanh %9 : vector<8x128xf32>
    %c0_10 = arith.constant 0 : index
    %c0_11 = arith.constant 0 : index
    %11 = vector.load %arg6[%c0_10, %c0_11] : memref<128x8xf32, #tpu.memory_space<vmem>>, vector<128x8xf32>
    %cst_12 = arith.constant dense<0.000000e+00> : vector<8x8xf32>
    %12 = tpu.matmul %10, %11, %cst_12 {dimension_numbers = #tpu.dot_dimension_numbers<[1], [0], [0], [1], [0, 0, 1, 1], [], []>} : vector<8x128xf32>, vector<128x8xf32>, vector<8x8xf32> -> vector<8x8xf32>
    %cst_13 = arith.constant dense<0xFF800000> : vector<8xf32>
    %13 = vector.multi_reduction <maximumf>, %12, %cst_13 [1] : vector<8x8xf32> to vector<8xf32>
    %14 = vector.shape_cast %13 : vector<8xf32> to vector<8x1xf32>
    %15 = vector.broadcast %14 : vector<8x1xf32> to vector<8x8xf32>
    %16 = arith.subf %12, %15 : vector<8x8xf32>
    %17 = math.exp %16 : vector<8x8xf32>
    %cst_14 = arith.constant dense<0.000000e+00> : vector<8xf32>
    %18 = vector.multi_reduction <add>, %17, %cst_14 [1] : vector<8x8xf32> to vector<8xf32>
    %19 = vector.shape_cast %18 : vector<8xf32> to vector<8x1xf32>
    %20 = tpu.reciprocal %19 : vector<8x1xf32> -> vector<8x1xf32>
    %21 = vector.broadcast %20 : vector<8x1xf32> to vector<8x8xf32>
    %22 = arith.mulf %17, %21 : vector<8x8xf32>
    %c0_15 = arith.constant 0 : index
    %c0_16 = arith.constant 0 : index
    %23 = vector.load %arg10[%c0_15, %c0_16] : memref<8x8xf32, #tpu.memory_space<vmem>>, vector<8x8xf32>
    tpu.vector_store %arg10[%c0_15, %c0_16], %22 {strides = array<i32>} : memref<8x8xf32, #tpu.memory_space<vmem>>, vector<8x8xf32>,
    %c0_17 = arith.constant 0 : index
    %c0_18 = arith.constant 0 : index
    %24 = vector.load %arg7[%c0_17, %c0_18] : memref<8x256xf32, #tpu.memory_space<vmem>>, vector<8x256xf32>
    %cst_19 = arith.constant dense<0.000000e+00> : vector<8x256xf32>
    %25 = tpu.matmul %22, %24, %cst_19 {dimension_numbers = #tpu.dot_dimension_numbers<[1], [0], [0], [1], [0, 0, 1, 1], [], []>} : vector<8x8xf32>, vector<8x256xf32>, vector<8x256xf32> -> vector<8x256xf32>
    %26 = arith.mulf %0, %25 : vector<8x256xf32>
    %c0_20 = arith.constant 0 : index
    %c0_21 = arith.constant 0 : index
    %27 = vector.load %arg8[%c0_20, %c0_21] : memref<256x32xf32, #tpu.memory_space<vmem>>, vector<256x32xf32>
    %cst_22 = arith.constant dense<0.000000e+00> : vector<8x32xf32>
    %28 = tpu.matmul %26, %27, %cst_22 {dimension_numbers = #tpu.dot_dimension_numbers<[1], [0], [0], [1], [0, 0, 1, 1], [], []>} : vector<8x256xf32>, vector<256x32xf32>, vector<8x32xf32> -> vector<8x32xf32>
    %c0_23 = arith.constant 0 : index
    %c0_24 = arith.constant 0 : index
    %29 = vector.load %arg9[%c0_23, %c0_24] : memref<8x32xf32, #tpu.memory_space<vmem>>, vector<8x32xf32>
    tpu.vector_store %arg9[%c0_23, %c0_24], %28 {strides = array<i32>} : memref<8x32xf32, #tpu.memory_space<vmem>>, vector<8x32xf32>,
    return
  }
  func.func @transform_0(%arg0: i32) -> (i32, i32) {
    %c0_i32 = arith.constant 0 : i32
    %c0_i32_0 = arith.constant 0 : i32
    return %arg0, %c0_i32 : i32, i32
  }
  func.func @transform_1(%arg0: i32) -> (i32, i32) {
    %c0_i32 = arith.constant 0 : i32
    %c0_i32_0 = arith.constant 0 : i32
    return %arg0, %c0_i32 : i32, i32
  }
  func.func @transform_2(%arg0: i32) -> (i32, i32) {
    %c0_i32 = arith.constant 0 : i32
    %c0_i32_0 = arith.constant 0 : i32
    %c0_i32_1 = arith.constant 0 : i32
    return %c0_i32, %c0_i32_0 : i32, i32
  }
  func.func @transform_3(%arg0: i32) -> (i32, i32) {
    %c0_i32 = arith.constant 0 : i32
    %c0_i32_0 = arith.constant 0 : i32
    %c0_i32_1 = arith.constant 0 : i32
    return %c0_i32, %c0_i32_0 : i32, i32
  }
  func.func @transform_4(%arg0: i32) -> (i32, i32) {
    %c0_i32 = arith.constant 0 : i32
    %c0_i32_0 = arith.constant 0 : i32
    %c0_i32_1 = arith.constant 0 : i32
    return %c0_i32, %c0_i32_0 : i32, i32
  }
  func.func @transform_5(%arg0: i32) -> (i32, i32) {
    %c0_i32 = arith.constant 0 : i32
    %c0_i32_0 = arith.constant 0 : i32
    %c0_i32_1 = arith.constant 0 : i32
    return %c0_i32, %c0_i32_0 : i32, i32
  }
  func.func @transform_6(%arg0: i32) -> (i32, i32) {
    %c0_i32 = arith.constant 0 : i32
    %c0_i32_0 = arith.constant 0 : i32
    %c0_i32_1 = arith.constant 0 : i32
    return %c0_i32, %c0_i32_0 : i32, i32
  }
  func.func @transform_7(%arg0: i32) -> (i32, i32) {
    %c0_i32 = arith.constant 0 : i32
    %c0_i32_0 = arith.constant 0 : i32
    %c0_i32_1 = arith.constant 0 : i32
    return %c0_i32, %c0_i32_0 : i32, i32
  }
  func.func @transform_8(%arg0: i32) -> (i32, i32) {
    %c0_i32 = arith.constant 0 : i32
    %c0_i32_0 = arith.constant 0 : i32
    return %arg0, %c0_i32 : i32, i32
  }
  func.func @transform_9(%arg0: i32) -> (i32, i32) {
    %c0_i32 = arith.constant 0 : i32
    %c0_i32_0 = arith.constant 0 : i32
    return %arg0, %c0_i32 : i32, i32
  }
}

</mosaic_0001>

<bundles_post_ra>
// kernel: tpu_custom_call.1
= control target key start
LH: loop header
LB: loop body
LE: loop exit
PB: predicated region body
PF: predicated region fallthrough
CT: control target
= control target key end

     0   :  { %15 = vsyncpa [#allocation3], 0  ;;  %v850_v7 = vmov 0.0|0.0   ;;  %vm851_vm0 = vmmov 0   ;;  %v852_v8 = vmov 0.0   ;;  %s1244_s0 = inlined_call_operand.vmem [shape: f32[8,256], index: 0, kind: input, shape index: {}]   ;;  %s1245_s1 = inlined_call_operand.vmem [shape: f32[8,64], index: 1, kind: input, shape index: {}]   ;;  %s1246_s2 = inlined_call_operand.vmem [shape: f32[256,128], index: 2, kind: input, shape index: {}]   ;;  %s1247_s3 = inlined_call_operand.vmem [shape: f32[64,128], index: 3, kind: input, shape index: {}]   ;;  %s1248_s4 = inlined_call_operand.vmem [shape: f32[1,128], index: 4, kind: input, shape index: {}]   ;;  %s1249_s5 = inlined_call_operand.vmem [shape: f32[128,8], index: 5, kind: input, shape index: {}]   ;;  %s1250_s6 = inlined_call_operand.vmem [shape: f32[8,256], index: 6, kind: input, shape index: {}]   ;;  %s1251_s7 = inlined_call_operand.vmem [shape: f32[256,32], index: 7, kind: input, shape index: {}]   ;;  %s1252_s8 = inlined_call_operand.hbm [shape: f32[8,32], index: 8, kind: output, shape index: {0}]   ;;  %s1253_s9 = inlined_call_operand.hbm [shape: f32[8,8], index: 9, kind: output, shape index: {1}]  }
   0x1   :  { %v52_v0 = vld [vmem:[%s1246_s2 + $0x80] sm:$0xff]  ;;  %v53_v1 = vld [vmem:[%s1246_s2 + $0x88] sm:$0xff]  ;;  %v54_v5 = vld [vmem:[%s1246_s2 + $0x90] sm:$0xff]  ;;  %691 = vmatprep.subr.bf16.mxu0 %v850_v7  ;;  %653 = vmatprep.mubr.msk.f32.mxu0 %vm851_vm0, %v852_v8 }
   0x2   :  { %v36_v2 = vld [vmem:[%s1246_s2] sm:$0xff]  ;;  %v703_v3 = vpack.c.bf16 %v53_v1, %v52_v0  ;;  %v37_v4 = vld [vmem:[%s1246_s2 + $0x8] sm:$0xff]  ;;  %v55_v6 = vld [vmem:[%s1246_s2 + $0x98] sm:$0xff] }
   0x3   :  { %v705_v9 = vpack.c.bf16 %v37_v4, %v36_v2  ;;  %v707_v10 = vpack.c.bf16 %v55_v6, %v54_v5  ;;  %v38_v11 = vld [vmem:[%s1246_s2 + $0x10] sm:$0xff]  ;;  %v39_v12 = vld [vmem:[%s1246_s2 + $0x18] sm:$0xff]  ;;  %v56_v13 = vld [vmem:[%s1246_s2 + $0xa0] sm:$0xff] }
   0x4   :  { %704 = vmatprep.subr.bf16.mxu1 %v703_v3  ;;  %v57_v14 = vld [vmem:[%s1246_s2 + $0xa8] sm:$0xff]  ;;  %v709_v15 = vpack.c.bf16 %v39_v12, %v38_v11  ;;  %v40_v17 = vld [vmem:[%s1246_s2 + $0x20] sm:$0xff]  ;;  %v58_v19 = vld [vmem:[%s1246_s2 + $0xb0] sm:$0xff] }
   0x5   :  { %706 = vmatpush3.bf16.msra.mxu1 %v705_v9  ;;  %v711_v16 = vpack.c.bf16 %v57_v14, %v56_v13  ;;  %v41_v18 = vld [vmem:[%s1246_s2 + $0x28] sm:$0xff]  ;;  %v59_v20 = vld [vmem:[%s1246_s2 + $0xb8] sm:$0xff]  ;;  %v68_v21 = vld [vmem:[%s1247_s3] sm:$0xff] }
   0x6   :  { %708 = vmatprep.subr.bf16.mxu1 %v707_v10  ;;  %v69_v22 = vld [vmem:[%s1247_s3 + $0x8] sm:$0xff]  ;;  %v713_v23 = vpack.c.bf16 %v41_v18, %v40_v17  ;;  %v70_v25 = vld [vmem:[%s1247_s3 + $0x10] sm:$0xff]  ;;  %v715_v26 = vpack.c.bf16 %v59_v20, %v58_v19  ;;  %v43_v28 = vld [vmem:[%s1246_s2 + $0x38] sm:$0xff] }
   0x7   :  { %v692_v24 = vpack.c.bf16 %v69_v22, %v68_v21  ;;  %v42_v27 = vld [vmem:[%s1246_s2 + $0x30] sm:$0xff]  ;;  %v71_v29 = vld [vmem:[%s1247_s3 + $0x18] sm:$0xff]  ;;  %v60_v30 = vld [vmem:[%s1246_s2 + $0xc0] sm:$0xff] }
   0x8   :  { %v61_v31 = vld [vmem:[%s1246_s2 + $0xc8] sm:$0xff]  ;;  %v695_v32 = vpack.c.bf16 %v71_v29, %v70_v25  ;;  %v72_v33 = vld [vmem:[%s1247_s3 + $0x20] sm:$0xff]  ;;  %v717_v35 = vpack.c.bf16 %v43_v28, %v42_v27  ;;  %v62_v40 = vld [vmem:[%s1246_s2 + $0xd0] sm:$0xff] }
   0x9   :  { %710 = vmatpush3.bf16.msra.mxu1 %v709_v15  ;;  %693 = vmatpush3.bf16.msra.mxu0 %v692_v24  ;;  %v73_v34 = vld [vmem:[%s1247_s3 + $0x28] sm:$0xff]  ;;  %v719_v36 = vpack.c.bf16 %v61_v31, %v60_v30  ;;  %v44_v37 = vld [vmem:[%s1246_s2 + $0x40] sm:$0xff]  ;;  %v63_v41 = vld [vmem:[%s1246_s2 + $0xd8] sm:$0xff] }
   0xa   :  { %712 = vmatprep.subr.bf16.mxu1 %v711_v16  ;;  %694 = vmatprep.subr.bf16.mxu0 %v850_v7  ;;  %v45_v38 = vld [vmem:[%s1246_s2 + $0x48] sm:$0xff]  ;;  %v698_v42 = vpack.c.bf16 %v73_v34, %v72_v33  ;;  %v74_v43 = vld [vmem:[%s1247_s3 + $0x30] sm:$0xff]  ;;  %v75_v44 = vld [vmem:[%s1247_s3 + $0x38] sm:$0xff] }
   0xb   :  { %v990_v39 = vld [vmem:[%s1244_s0 + $0x8] sm:$0xff]  ;;  %v721_v45 = vpack.c.bf16 %v45_v38, %v44_v37 }
   0xc   :  { %214 = vmatprep.mubr.f32.mxu1 %v990_v39 }
   0xd   :  { %714 = vmatpush3.bf16.msra.mxu1 %v713_v23  ;;  %696 = vmatpush3.bf16.msra.mxu0 %v695_v32 }
   0xe   :  { %716 = vmatprep.subr.bf16.mxu1 %v715_v26  ;;  %697 = vmatprep.subr.bf16.mxu0 %v850_v7 }
  0x11   :  { %718 = vmatpush3.bf16.msra.mxu1 %v717_v35 }
  0x12   :  { %16 = vsyncpa [#allocation5], 0  ;;  %720 = vmatprep.subr.bf16.mxu1 %v719_v36  ;;  %v723_v46 = vpack.c.bf16 %v63_v41, %v62_v40  ;;  %v46_v47 = vld [vmem:[%s1246_s2 + $0x50] sm:$0xff]  ;;  %v47_v48 = vld [vmem:[%s1246_s2 + $0x58] sm:$0xff]  ;;  %699 = vmatpush3.bf16.msra.mxu0 %v698_v42  ;;  %v701_v51 = vpack.c.bf16 %v75_v44, %v74_v43  ;;  %vm76_vm1 = vcmask 523264   ;;  %vm315_vm2 = vcmask 64512  }
  0x13   :  { %v64_v49 = vld [vmem:[%s1246_s2 + $0xe0] sm:$0xff]  ;;  %v65_v50 = vld [vmem:[%s1246_s2 + $0xe8] sm:$0xff]  ;;  %700 = vmatprep.subr.bf16.mxu0 %v850_v7  ;;  %v725_v54 = vpack.c.bf16 %v47_v48, %v46_v47  ;;  %v66_v58 = vld [vmem:[%s1246_s2 + $0xf0] sm:$0xff]  ;;  %s853_s25 = smov [#allocation4]  }
  0x14   :  { %v229_v52 = vld [vmem:[%s1249_s5] sm:$0xff]  ;;  %v230_v53 = vld [vmem:[%s1249_s5 + $0x8] sm:$0xff]  ;;  %v727_v55 = vpack.c.bf16 %v65_v50, %v64_v49  ;;  %v67_v59 = vld [vmem:[%s1246_s2 + $0xf8] sm:$0xff] }
  0x15   :  { %722 = vmatpush3.bf16.msra.mxu1 %v721_v45  ;;  %v48_v56 = vld [vmem:[%s1246_s2 + $0x60] sm:$0xff]  ;;  %v49_v57 = vld [vmem:[%s1246_s2 + $0x68] sm:$0xff]  ;;  %v736_v61 = vpack.c.bf16 %v230_v53, %v229_v52  ;;  %v231_v62 = vld [vmem:[%s1249_s5 + $0x10] sm:$0xff]  ;;  %v731_v1 = vpack.c.bf16 %v67_v59, %v66_v58 }
  0x16   :  { %724 = vmatprep.subr.bf16.mxu1 %v723_v46  ;;  %702 = vmatpush3.bf16.msra.mxu0 %v701_v51  ;;  %v35_v60 = vld [vmem:[%s1245_s1] sm:$0xff]  ;;  %v232_v63 = vld [vmem:[%s1249_s5 + $0x18] sm:$0xff]  ;;  %v729_v0 = vpack.c.bf16 %v49_v57, %v48_v56  ;;  %v50_v2 = vld [vmem:[%s1246_s2 + $0x70] sm:$0xff] }
  0x17   :  { %735 = vmatprep.subr.bf16.mxu0 %v850_v7  ;;  %v51_v3 = vld [vmem:[%s1246_s2 + $0x78] sm:$0xff]  ;;  %v739_v4 = vpack.c.bf16 %v232_v63, %v231_v62  ;;  %v233_v5 = vld [vmem:[%s1249_s5 + $0x20] sm:$0xff]  ;;  %v234_v6 = vld [vmem:[%s1249_s5 + $0x28] sm:$0xff] }
  0x18   :  { %v733_v9 = vpack.c.bf16 %v51_v3, %v50_v2  ;;  %v742_v10 = vpack.c.bf16 %v234_v6, %v233_v5  ;;  %v1066_v11 = vld [vmem:[%s1244_s0] sm:$0xff]  ;;  %v235_v12 = vld [vmem:[%s1249_s5 + $0x30] sm:$0xff]  ;;  %v236_v13 = vld [vmem:[%s1249_s5 + $0x38] sm:$0xff] }
  0x19   :  { %726 = vmatpush3.bf16.msra.mxu1 %v725_v54  ;;  %654 = vmatmul.mubr.msk.f32.vlgmr.msra.gmra.mrb[0].mxu0 %vm76_vm1, %v35_v60  ;;  %v745_v14 = vpack.c.bf16 %v236_v13, %v235_v12  ;;  %v237_v15 = vld [vmem:[%s1249_s5 + $0x40] sm:$0xff]  ;;  %v238_v16 = vld [vmem:[%s1249_s5 + $0x48] sm:$0xff]  ;;  %v239_v18 = vld [vmem:[%s1249_s5 + $0x50] sm:$0xff] }
  0x1a   :  { %728 = vmatprep.subr.bf16.mxu1 %v727_v55  ;;  %737 = vmatpush3.bf16.msra.mxu0 %v736_v61  ;;  %v748_v17 = vpack.c.bf16 %v238_v16, %v237_v15  ;;  %v240_v19 = vld [vmem:[%s1249_s5 + $0x58] sm:$0xff]  ;;  %v241_v21 = vld [vmem:[%s1249_s5 + $0x60] sm:$0xff]  ;;  %v242_v22 = vld [vmem:[%s1249_s5 + $0x68] sm:$0xff] }
  0x1b   :  { %688 = vmatprep.mubr.msk.f32.mxu0 %vm851_vm0, %v852_v8  ;;  %738 = vmatprep.subr.bf16.mxu0 %v850_v7  ;;  %v751_v20 = vpack.c.bf16 %v240_v19, %v239_v18  ;;  %v754_v23 = vpack.c.bf16 %v242_v22, %v241_v21  ;;  %v243_v24 = vld [vmem:[%s1249_s5 + $0x70] sm:$0xff]  ;;  %v244_v25 = vld [vmem:[%s1249_s5 + $0x78] sm:$0xff]  ;;  %v539_v32 = vld [vmem:[%s1248_s4] ss:$0 sm:$0xff] }
  0x1c   :  { %v757_v26 = vpack.c.bf16 %v244_v25, %v243_v24  ;;  %v328_v44 = vld [vmem:[%s1250_s6] sm:$0xff]  ;;  %v423_v46 = vld [vmem:[%s1251_s7 + $0x88] sm:$0xff]  ;;  %v424_v50 = vld [vmem:[%s1251_s7 + $0x90] sm:$0xff] }
  0x1d   :  { %730 = vmatpush3.bf16.msra.mxu1 %v729_v0  ;;  %v422_v45 = vld [vmem:[%s1251_s7 + $0x80] sm:$0xff]  ;;  %v407_v49 = vld [vmem:[%s1251_s7 + $0x8] sm:$0xff]  ;;  %v425_v51 = vld [vmem:[%s1251_s7 + $0x98] sm:$0xff] }
  0x1e   :  { %732 = vmatprep.subr.bf16.mxu1 %v731_v1  ;;  %740 = vmatpush3.bf16.msra.mxu0 %v739_v4  ;;  %v406_v47 = vld [vmem:[%s1251_s7] sm:$0xff]  ;;  %v759_v48 = vpack.c.bf16 %v423_v46, %v422_v45  ;;  %v763_v53 = vpack.c.bf16 %v425_v51, %v424_v50  ;;  %v408_v54 = vld [vmem:[%s1251_s7 + $0x10] sm:$0xff]  ;;  %v409_v55 = vld [vmem:[%s1251_s7 + $0x18] sm:$0xff] }
  0x1f   :  { %741 = vmatprep.subr.bf16.mxu0 %v850_v7  ;;  %v761_v52 = vpack.c.bf16 %v407_v49, %v406_v47  ;;  %v426_v56 = vld [vmem:[%s1251_s7 + $0xa0] sm:$0xff]  ;;  %v427_v57 = vld [vmem:[%s1251_s7 + $0xa8] sm:$0xff]  ;;  %v765_v58 = vpack.c.bf16 %v409_v55, %v408_v54  ;;  %v428_v62 = vld [vmem:[%s1251_s7 + $0xb0] sm:$0xff] }
  0x20   :  { %v767_v59 = vpack.c.bf16 %v427_v57, %v426_v56  ;;  %v410_v60 = vld [vmem:[%s1251_s7 + $0x20] sm:$0xff]  ;;  %v411_v61 = vld [vmem:[%s1251_s7 + $0x28] sm:$0xff]  ;;  %v429_v63 = vld [vmem:[%s1251_s7 + $0xb8] sm:$0xff] }
  0x21   :  { %734 = vmatpush3.bf16.msra.mxu1 %v733_v9  ;;  %v769_v0 = vpack.c.bf16 %v411_v61, %v410_v60  ;;  %v771_v1 = vpack.c.bf16 %v429_v63, %v428_v62  ;;  %v412_v2 = vld [vmem:[%s1251_s7 + $0x30] sm:$0xff]  ;;  %v413_v3 = vld [vmem:[%s1251_s7 + $0x38] sm:$0xff]  ;;  %v430_v4 = vld [vmem:[%s1251_s7 + $0xc0] sm:$0xff] }
  0x22   :  { %743 = vmatpush3.bf16.msra.mxu0 %v742_v10  ;;  %760 = vmatprep.subr.bf16.mxu1 %v759_v48  ;;  %v431_v5 = vld [vmem:[%s1251_s7 + $0xc8] sm:$0xff]  ;;  %v773_v6 = vpack.c.bf16 %v413_v3, %v412_v2  ;;  %v414_v10 = vld [vmem:[%s1251_s7 + $0x40] sm:$0xff]  ;;  %v432_v13 = vld [vmem:[%s1251_s7 + $0xd0] sm:$0xff] }
  0x23   :  { %744 = vmatprep.subr.bf16.mxu0 %v850_v7  ;;  %v775_v9 = vpack.c.bf16 %v431_v5, %v430_v4  ;;  %v415_v12 = vld [vmem:[%s1251_s7 + $0x48] sm:$0xff]  ;;  %v417_v18 = vld [vmem:[%s1251_s7 + $0x58] sm:$0xff]  ;;  %v434_v19 = vld [vmem:[%s1251_s7 + $0xe0] sm:$0xff] }
  0x24   :  { %215 = vmatmul.mubr.f32.vlgmr.msra.gmra.mrb[0].mxu1 %v1066_v11  ;;  %v777_v15 = vpack.c.bf16 %v415_v12, %v414_v10  ;;  %v419_v24 = vld [vmem:[%s1251_s7 + $0x68] sm:$0xff] }
  0x25   :  { %762 = vmatpush3.bf16.msra.mxu1 %v761_v52 }
  0x26   :  { %746 = vmatpush3.bf16.msra.mxu0 %v745_v14  ;;  %764 = vmatprep.subr.bf16.mxu1 %v763_v53  ;;  %v433_v14 = vld [vmem:[%s1251_s7 + $0xd8] sm:$0xff] }
  0x27   :  { %747 = vmatprep.subr.bf16.mxu0 %v850_v7  ;;  %v779_v16 = vpack.c.bf16 %v433_v14, %v432_v13 }
  0x29   :  { %766 = vmatpush3.bf16.msra.mxu1 %v765_v58 }
  0x2a   :  { %749 = vmatpush3.bf16.msra.mxu0 %v748_v17  ;;  %768 = vmatprep.subr.bf16.mxu1 %v767_v59  ;;  %v416_v17 = vld [vmem:[%s1251_s7 + $0x50] sm:$0xff] }
  0x2b   :  { %750 = vmatprep.subr.bf16.mxu0 %v850_v7  ;;  %v781_v21 = vpack.c.bf16 %v417_v18, %v416_v17 }
  0x2d   :  { %770 = vmatpush3.bf16.msra.mxu1 %v769_v0 }
  0x2e   :  { %752 = vmatpush3.bf16.msra.mxu0 %v751_v20  ;;  %772 = vmatprep.subr.bf16.mxu1 %v771_v1  ;;  %v435_v20 = vld [vmem:[%s1251_s7 + $0xe8] sm:$0xff] }
  0x2f   :  { %753 = vmatprep.subr.bf16.mxu0 %v850_v7  ;;  %v783_v22 = vpack.c.bf16 %v435_v20, %v434_v19 }
  0x31   :  { %774 = vmatpush3.bf16.msra.mxu1 %v773_v6 }
  0x32   :  { %755 = vmatpush3.bf16.msra.mxu0 %v754_v23  ;;  %776 = vmatprep.subr.bf16.mxu1 %v775_v9  ;;  %v418_v23 = vld [vmem:[%s1251_s7 + $0x60] sm:$0xff] }
  0x33   :  { %756 = vmatprep.subr.bf16.mxu0 %v850_v7  ;;  %v785_v25 = vpack.c.bf16 %v419_v24, %v418_v23 }
  0x35   :  { %778 = vmatpush3.bf16.msra.mxu1 %v777_v15 }
  0x36   :  { %758 = vmatpush3.bf16.msra.mxu0 %v757_v26  ;;  %780 = vmatprep.subr.bf16.mxu1 %v779_v16 }
  0x39   :  { %782 = vmatpush3.bf16.msra.mxu1 %v781_v21 }
  0x3a   :  { %784 = vmatprep.subr.bf16.mxu1 %v783_v22 }
  0x3d   :  { %786 = vmatpush3.bf16.msra.mxu1 %v785_v25 }
  0xec   :  { %v146_v27 = vpop.f32.mrb[0].mxu0 }
  0xed   :  { %v655_v28 = vpop.f32.mrb[1].mxu0 }
  0xf7   :  { %v582_v29 = vpop.f32.mrb[0].mxu1 }
  0xf8   :  { %v583_v30 = vpop.f32.mrb[1].mxu1 }
  0xf9   :  { %v584_v31 = vadd.f32 %v583_v30, %v582_v29  ;;  %v436_v29 = vld [vmem:[%s1251_s7 + $0xf0] sm:$0xff]  ;;  %v437_v30 = vld [vmem:[%s1251_s7 + $0xf8] sm:$0xff] }
  0xfb   :  { %v217_v33 = vadd.f32 %v584_v31, %v146_v27  ;;  %v787_v31 = vpack.c.bf16 %v437_v30, %v436_v29 }
  0xfd   :  { %v227_v34 = vadd.f32 %v539_v32, %v217_v33  ;;  %v420_v32 = vld [vmem:[%s1251_s7 + $0x70] sm:$0xff]  ;;  %v421_v33 = vld [vmem:[%s1251_s7 + $0x78] sm:$0xff]  ;;  %788 = vmatprep.subr.bf16.mxu1 %v787_v31 }
  0xff   :  { %796 = vtanh.f32 %v227_v34  ;;  %v789_v34 = vpack.c.bf16 %v421_v33, %v420_v32 }
 0x101   :  { %790 = vmatpush3.bf16.msra.mxu1 %v789_v34 }
 0x109   :  { %v797_v35 = vpop.eup %796 }
 0x10a   :  { %689 = vmatmul.mubr.f32.vlgmr.msra.gmra.mrb[2].mxu0 %v797_v35 }
 0x10b   :  { %397 = vmatprep.mubr.f32.mxu0 %v852_v8  ;;  %v329_v8 = vld [vmem:[%s1250_s6 + $0x8] sm:$0xff]  ;;  %s526_s6 = sshll.u32 %s853_s25, 4  ;;  %s527_s6 = int_to_ptr.vmem [resolvable:$true] %s526_s6 }
 0x10c   :  { %333 = vmatprep.subr.mxu0 %v329_v8  ;;  %s802_s26 = scalar_lea.vmem %s527_s6, 128  ;;  %p807_p1 = scmp.lt.s32.totalorder %s527_s6, %s527_s6 }
 0x10d   :  { %334 = vmatpush1.msra.mxu0 %v328_v44  ;;  %p803_p0 = scmp.ne.s32.totalorder %s527_s6, %s802_s26  ;;  %p808_p2 = scmp.lt.s32.totalorder %s802_s26, %s802_s26 }
 0x10f   :  { %p809_p3 = por %p808_p2, %p807_p1 }
 0x111   :  { %p810_p4 = pnand %p809_p3, %p803_p0 }
 0x1dd   :  { %v311_v36 = vpop.f32.mrb[2].mxu0 }
 0x1de   :  { %v690_v7 = vpop.f32.mrb[3].mxu0  ;;  %v316_v37 = vsel %vm315_vm2, %v311_v36, -inf }
 0x1df   :  { %317 = vmax.xlane.f32.xlu0 %v316_v37 }
 0x26c   :  { %v318_v38 = vpop.xlane.xlu0 %317 }
 0x26d   :  { %v319_v40 = vsub.f32 %v311_v36, %v318_v38 }
 0x26f   :  { %v320_v41 = vmul.f32 1.442695, %v319_v40 }
 0x271   :  { %798 = vpow2.f32 %v320_v41 }
 0x27b   :  { %v1109_v42 = vpop.eup %798 }
 0x27c   :  { %v322_v43 = vsel %vm315_vm2, %v1109_v42, 0.0 }
 0x27d   :  { %323 = vadd.xlane.f32.xlu0 %v322_v43 }
 0x30a   :  { %v324_v26 = vpop.xlane.xlu0 %323 }
 0x30b   :  { %800 = vrcp.f32 %v324_v26 }
 0x315   :  { %v801_v27 = vpop.eup %800 }
 0x316   :  { %v326_v28 = vmul.f32 %v801_v27, %v1109_v42 }
 0x318   :  { %327 = vst.msk [vmem:[#allocation4] sm:$0xff] %vm315_vm2, %v326_v28  ;;  %540 = vmatmul.mubr.msk.f32.vlgmr.msra.gmra.mrb[4].mxu0 %vm315_vm2, %v326_v28 }
 0x3eb   :  { %v399_v35 = vpop.f32.mrb[4].mxu0 }
 0x3ec   :  { %v401_v36 = vpop.f32.mrb[5].mxu0  ;;  %v404_v37 = vmul.f32 %v399_v35, %v1066_v11 }
 0x3ed   :  { %v405_v7 = vmul.f32 %v401_v36, %v990_v39 }
 0x3ef   :  { %502 = vmatprep.mubr.f32.mxu1 %v405_v7 }
 0x3f0   :  { %503 = vmatmul.mubr.f32.vlgmr.msra.gmra.mrb[2].mxu1 %v404_v37 }
 0x3f1   :  { %813 = shalt.err (!%p810_p4)
}
 0x3f2   :  { %s814_s28 = scalar_lea.hbm %s1253_s9, 128 }
 0x3f3   :  { %p815_p5 = scmp.ne.s32.totalorder %s1253_s9, %s814_s28  ;;  %p818_p6 = scmp.lt.u32.totalorder %s814_s28, %s1253_s9 }
 0x3f5   :  { %p820_p7 = pnand %p818_p6, %p815_p5 }
 0x3f7   :  { %823 = shalt.err (!%p820_p7)
}
 0x3f8   :  { %529 = dma.vmem_to_hbm [thread:$0]  %s527_s6, 128, %s1253_s9, [#allocation5]   ;;  %vm508_vm3 = vcmask 261120  }
 0x3f9   :  { %s854_s1 = smov [#allocation2]  }
 0x3fa   :  { %s516_s14 = sshll.u32 %s854_s1, 4  ;;  %s517_s14 = int_to_ptr.vmem [resolvable:$true] %s516_s14 }
 0x3fb   :  { %s824_s15 = scalar_lea.vmem %s517_s14, 128  ;;  %p829_p9 = scmp.lt.s32.totalorder %s517_s14, %s517_s14 }
 0x3fc   :  { %p825_p8 = scmp.ne.s32.totalorder %s517_s14, %s824_s15  ;;  %p830_p10 = scmp.lt.s32.totalorder %s824_s15, %s824_s15 }
 0x3fe   :  { %p831_p11 = por %p830_p10, %p829_p9 }
 0x400   :  { %p832_p12 = pnand %p831_p11, %p825_p8 }
 0x4c3   :  { %v634_v39 = vpop.f32.mrb[2].mxu1 }
 0x4c4   :  { %v635_v11 = vpop.f32.mrb[3].mxu1 }
 0x4c5   :  { %v636_v38 = vadd.f32 %v635_v11, %v634_v39 }
 0x4c7   :  { %509 = vst.msk [vmem:[#allocation2] sm:$0xff] %vm508_vm3, %v636_v38 }
 0x4c8   :  { %835 = shalt.err (!%p832_p12)
}
 0x4c9   :  { %s836_s4 = scalar_lea.hbm %s1252_s8, 128 }
 0x4ca   :  { %p837_p13 = scmp.ne.s32.totalorder %s1252_s8, %s836_s4  ;;  %p840_p0 = scmp.lt.u32.totalorder %s836_s4, %s1252_s8 }
 0x4cc   :  { %p842_p1 = pnand %p840_p0, %p837_p13 }
 0x4ce   :  { %845 = shalt.err (!%p842_p1)
}
 0x4cf   :  { %519 = dma.vmem_to_hbm [thread:$0]  %s517_s14, 128, %s1252_s8, [#allocation3]  }
 0x4d0   :  { %846 = dma.done.wait [#allocation3], 128  }
 0x4d1   :  { %847 = vsyncadd [#allocation3], 4294967168 }
 0x4d2   :  { %848 = dma.done.wait [#allocation5], 128  }
 0x4d3   :  { %849 = vsyncadd [#allocation5], 4294967168 }
 0x4d4   :  { %536 = vsyncpa [#allocation3], 1 }
 0x4d5   :  { %537 = vsyncpa [#allocation5], 1 }

</bundles_post_ra>
